<compile_context>
chip_gen: v6e
topology: v6e:2x2x1
jax: 0.10.0
libtpu: 0.0.40
codegen_flags: <defaults>
</compile_context>

<pallas_src>
import functools

import jax
import jax.numpy as jnp
import numpy as np
from jax import lax
from jax.experimental import pallas as pl
from jax.experimental.pallas import tpu as pltpu


def _combined_loss_kernel(logits_ref, targets_ref,
                          counts_ref, ce1_ref, focal_ref,
                          *, n_total, tile_n, tiles_per_group, gamma):
    g = pl.program_id(0)          # parallel group (megacore split on v7x)
    t = pl.program_id(1)          # sequential tile within the group

    @pl.when(t == 0)
    def _init():
        counts_ref[...] = jnp.zeros_like(counts_ref)
        ce1_ref[...] = jnp.zeros_like(ce1_ref)
        focal_ref[...] = jnp.zeros_like(focal_ref)

    logits = logits_ref[...].astype(jnp.float32)          # (TN, C) f32 compute copy
    targets = targets_ref[...]                            # (TN, 1) int32
    tn, c = logits.shape

    # Row validity for partial / overflow tiles (see masking invariant above).
    tile_idx = g * tiles_per_group + t                    # logical (unclamped) tile
    row_ids = tile_idx * tile_n + lax.broadcasted_iota(jnp.int32, (tn, 1), 0)
    valid = row_ids < n_total                              # (TN, 1) bool

    # Boolean "one-hot" predicate (never materialized as f32).
    class_ids = lax.broadcasted_iota(jnp.int32, (tn, c), 1)
    mask = (class_ids == targets) & valid                  # (TN, C) bool

    # ---- per-class counts (global inverse-frequency weights formed in wrapper) ----
    counts_ref[...] += jnp.sum(jnp.where(mask, 1.0, 0.0),
                               axis=0, keepdims=True).reshape(1, 1, c)

    # ---- unclamped log-softmax CE (focal path) ----
    m2 = jnp.max(logits, axis=-1, keepdims=True)                            # (TN, 1)
    lse2 = jnp.log(jnp.sum(jnp.exp(logits - m2), axis=-1, keepdims=True)) + m2
    tgt2 = jnp.sum(jnp.where(mask, logits, 0.0), axis=-1, keepdims=True)    # gather
    ce2 = lse2 - tgt2                                                       # (TN, 1)

    # ---- clamped CE (weighted-CE path).  The full clipped exp/logsumexp pass is
    #      only executed when some VALID logit exceeds [-100, 100]; otherwise the
    #      clipped result is bit-identical to the unclamped one and is reused. ----
    needs_clip = jnp.any((jnp.abs(logits) > 100.0) & valid)

    @pl.when(jnp.logical_not(needs_clip))
    def _reuse_unclipped():
        ce1_ref[...] += jnp.sum(jnp.where(mask, ce2, 0.0),
                                axis=0, keepdims=True).reshape(1, 1, c)

    @pl.when(needs_clip)
    def _recompute_clipped():
        # clip is monotone -> max commutes with clip; the one-hot gather picks a
        # single element -> it commutes with clip too, so m2 / tgt2 are reused.
        lc = jnp.clip(logits, -100.0, 100.0)
        m1 = jnp.clip(m2, -100.0, 100.0)
        lse1 = jnp.log(jnp.sum(jnp.exp(lc - m1), axis=-1, keepdims=True)) + m1
        tgt1 = jnp.clip(tgt2, -100.0, 100.0)
        ce1 = lse1 - tgt1                                                   # (TN, 1)
        ce1_ref[...] += jnp.sum(jnp.where(mask, ce1, 0.0),
                                axis=0, keepdims=True).reshape(1, 1, c)

    # ---- focal numerator, accumulated per class.  The alpha gather is applied at
    #      finalize: sum_i alpha[t_i] f_i == sum_c alpha_c * sum_{i: t_i = c} f_i. ----
    pt = jnp.exp(-ce2)
    omp = 1.0 - pt
    if float(gamma) == 2.0:
        mod = omp * omp                        # VPU square, no EUP pow / no NaN
    else:
        mod = jnp.maximum(omp, 0.0) ** gamma   # intentional clamp vs. torch NaN
    focal_rows = mod * ce2                                                  # (TN, 1)
    focal_ref[...] += jnp.sum(jnp.where(mask, focal_rows, 0.0),
                              axis=0, keepdims=True).reshape(1, 1, c)


def _vmem_limit_bytes():
    """Per-generation scoped-VMEM limit: ~3/4 of physical, capped at 96 MiB.
    (v5e/v6e: 128 MiB physical -> 96 MiB; v7x: 64 MiB -> 48 MiB.)"""
    try:
        phys = int(pltpu.get_tpu_info().vmem_capacity_bytes)
        if phys < (16 << 20):
            raise ValueError
    except Exception:
        return 48 * 1024 * 1024                 # safe on every generation
    return min(phys * 3 // 4, 96 * 1024 * 1024)


def _pick_tile(n, c, in_itemsize, vmem_limit_bytes):
    """Largest safe row tile (multiple of 8, <= 2048) under a real VMEM model."""
    if n <= 8:
        return n                                 # full dims -> always legal
    c_pad = ((c + 127) // 128) * 128             # VMEM pads the lane (last) dim to 128
    # Per-row VMEM bytes: double-buffered native-dtype input tile + ~12 live f32
    # slabs (f32 logits copy, exp/clip temporaries, boolean mask, iota, and the
    # (TN,1) column temps which still occupy full 128-lane vregs).
    per_row = c_pad * (2 * in_itemsize + 12 * 4)
    budget = vmem_limit_bytes // 2               # headroom for outputs / pipeline state
    # TODO(synk): C is never tiled; vocab-sized C needs an online-softmax
    # C-chunked variant.  Fail early instead of a late Mosaic VMEM OOM.
    if 8 * per_row > budget:
        raise ValueError(
            f"num_classes={c} too large for an untiled class axis "
            f"(min working set {8 * per_row} B exceeds VMEM budget {budget} B).")
    tn = budget // per_row
    tn = max(8, min(2048, (tn // 8) * 8))
    return n if tn >= n else tn


def combined_loss(logits, targets, *, num_classes=None, focal_alpha=None,
                  gamma=2.0, mix_alpha=0.75, tile_n=None, eps=1e-8):
    """logits: (N, C) float (any float dtype); targets: (N,) int.  Scalar f32 loss."""
    n, c = logits.shape
    if num_classes is None:
        num_classes = c
    assert num_classes == c
    if focal_alpha is None:
        alpha = jnp.ones((c,), jnp.float32)          # FocalLoss default alpha
    else:
        alpha = jnp.asarray(focal_alpha, jnp.float32).reshape(c)

    targets2d = targets.astype(jnp.int32).reshape(n, 1)
    itemsize = jnp.dtype(logits.dtype).itemsize

    vmem_limit = _vmem_limit_bytes()
    if tile_n is None:
        tile_n = _pick_tile(n, c, itemsize, vmem_limit)
    tiles_total = int(pl.cdiv(n, tile_n))

    # Leading size-2 "parallel" group axis -> v7x megacore sharding of the row
    # stream (sequential / harmless on single-TensorCore v5e/v6e).
    num_groups = 2 if tiles_total >= 2 else 1
    tiles_per_group = int(pl.cdiv(tiles_total, num_groups))

    def in_map(gi, ti):
        # Overflow tiles of the last group are clamped to the last real block; the
        # kernel's `valid` mask (computed from the UNclamped logical index) makes
        # their contribution exactly zero.
        idx = jnp.minimum(gi * tiles_per_group + ti, tiles_total - 1)
        return (idx, 0)

    out_map = lambda gi, ti: (gi, 0, 0)

    kernel = functools.partial(
        _combined_loss_kernel,
        n_total=n, tile_n=tile_n, tiles_per_group=tiles_per_group,
        gamma=float(gamma))

    cost = pl.CostEstimate(
        flops=12 * n * c,
        transcendentals=n * c + 4 * n,
        bytes_accessed=n * c * itemsize + n * 4 + 3 * num_groups * c * 4)

    part_shape = jax.ShapeDtypeStruct((num_groups, 1, c), jnp.float32)
    grid_spec = pltpu.PrefetchScalarGridSpec(
        num_scalar_prefetch=0,
        grid=(num_groups, tiles_per_group),
        in_specs=[
            pl.BlockSpec((tile_n, c), in_map),        # logits tile, native dtype
            pl.BlockSpec((tile_n, 1), in_map),        # targets tile
        ],
        out_specs=[
            pl.BlockSpec((1, 1, c), out_map),         # per-group class counts
            pl.BlockSpec((1, 1, c), out_map),          # per-group clamped-CE sums
            pl.BlockSpec((1, 1, c), out_map),          # per-group focal sums
        ],
    )

    counts_p, ce1_p, focal_p = pl.pallas_call(
        kernel,
        out_shape=(part_shape, part_shape, part_shape),
        grid_spec=grid_spec,
        compiler_params=pltpu.CompilerParams(
            dimension_semantics=("parallel", "arbitrary"),
            vmem_limit_bytes=vmem_limit),
        cost_estimate=cost,
    )(logits, targets2d)

    # ---- cheap finalize (global weights, alpha gather, mix) in the wrapper ----
    counts = jnp.sum(counts_p, axis=(0, 1))           # (C,) == torch.bincount(targets)
    ce1_sums = jnp.sum(ce1_p, axis=(0, 1))
    focal_sums = jnp.sum(focal_p, axis=(0, 1))
    total = jnp.sum(counts)                            # == N
    w = total / (counts + eps)
    w = w / jnp.sum(w)
    # F.cross_entropy(weight=w, reduction='mean') == sum_i w_{t_i} ce_i / sum_i w_{t_i}
    wce = jnp.sum(w * ce1_sums) / jnp.sum(w * counts)
    focal = jnp.sum(alpha * focal_sums) / total
    return mix_alpha * wce + (1.0 - mix_alpha) * focal


def _reference_combined_loss(logits, targets, gamma=2.0, mix_alpha=0.75, eps=1e-8):
    """Pure-JAX replica of the PyTorch forward, for numerical sanity checks."""
    logits = logits.astype(jnp.float32)
    n, c = logits.shape
    onehot = jax.nn.one_hot(targets, c, dtype=jnp.float32)

    counts = jnp.sum(onehot, axis=0)
    total = jnp.sum(counts)
    w = total / (counts + eps)
    w = w / jnp.sum(w)
    logits_c = jnp.clip(logits, -100.0, 100.0)
    ce1 = jax.nn.logsumexp(logits_c, axis=-1) - jnp.sum(onehot * logits_c, axis=-1)
    w_i = w[targets]
    wce = jnp.sum(w_i * ce1) / jnp.sum(w_i)

    ce2 = jax.nn.logsumexp(logits, axis=-1) - jnp.sum(onehot * logits, axis=-1)
    pt = jnp.exp(-ce2)
    at = jnp.ones((c,), jnp.float32)[targets]
    focal = jnp.mean(at * (1.0 - pt) ** gamma * ce2)
    return mix_alpha * wce + (1 - mix_alpha) * focal


if __name__ == "__main__":
    key = jax.random.PRNGKey(0)

    # --- case 1: small, module-like shapes (batch=8, num_classes=3) ---
    k1, k2, key = jax.random.split(key, 3)
    logits = jax.random.normal(k1, (8, 3), dtype=jnp.float32)
    targets = jax.random.randint(k2, (8,), 0, 3, dtype=jnp.int32)
    loss = jax.block_until_ready(combined_loss(logits, targets, num_classes=3))
    ref = jax.block_until_ready(_reference_combined_loss(logits, targets))
    np.testing.assert_allclose(np.asarray(loss), np.asarray(ref), rtol=1e-5, atol=1e-5)

    # --- case 2: 2 parallel groups x 2 tiles, partial last tile + overflow tile ---
    k1, k2, key = jax.random.split(key, 3)
    logits2 = jax.random.normal(k1, (300, 16), dtype=jnp.float32)
    targets2 = jax.random.randint(k2, (300,), 0, 16, dtype=jnp.int32)
    loss2 = jax.block_until_ready(
        combined_loss(logits2, targets2, num_classes=16, tile_n=128))
    ref2 = jax.block_until_ready(_reference_combined_loss(logits2, targets2))
    np.testing.assert_allclose(np.asarray(loss2), np.asarray(ref2), rtol=1e-5, atol=1e-5)

    # --- case 3: native bf16 logits with |x| > 100 -> exercises the clipped branch ---
    k1, k2, key = jax.random.split(key, 3)
    logits3 = (jax.random.normal(k1, (64, 8), dtype=jnp.float32) * 80.0).astype(jnp.bfloat16)
    targets3 = jax.random.randint(k2, (64,), 0, 8, dtype=jnp.int32)
    loss3 = jax.block_until_ready(combined_loss(logits3, targets3, num_classes=8))
    ref3 = jax.block_until_ready(_reference_combined_loss(logits3, targets3))
    np.testing.assert_allclose(np.asarray(loss3), np.asarray(ref3), rtol=1e-3, atol=1e-3)

    # --- case 4: larger input using the default VMEM-budgeted tile size ---
    k1, k2 = jax.random.split(key, 2)
    logits4 = jax.random.normal(k1, (5000, 16), dtype=jnp.bfloat16)
    targets4 = jax.random.randint(k2, (5000,), 0, 16, dtype=jnp.int32)
    loss4 = jax.block_until_ready(combined_loss(logits4, targets4, num_classes=16))
    ref4 = jax.block_until_ready(_reference_combined_loss(logits4, targets4))
    np.testing.assert_allclose(np.asarray(loss4), np.asarray(ref4), rtol=1e-3, atol=1e-3)

    print("KERNEL_OK")
</pallas_src>

<mosaic_0001>
module attributes {stable_mosaic.version = 11 : i64} {
  func.func @_combined_loss_kernel(%arg0: i32, %arg1: i32, %arg2: memref<8x3xf32, #tpu.memory_space<vmem>>, %arg3: memref<8x1xi32, #tpu.memory_space<vmem>>, %arg4: memref<1x1x3xf32, #tpu.memory_space<vmem>>, %arg5: memref<1x1x3xf32, #tpu.memory_space<vmem>>, %arg6: memref<1x1x3xf32, #tpu.memory_space<vmem>>) attributes {dimension_semantics = [#tpu.dimension_semantics<parallel>, #tpu.dimension_semantics<arbitrary>], iteration_bounds = array<i64: 1, 1>, scalar_prefetch = 0 : i64, scratch_operands = 0 : i64, tpu.core_type = #tpu.core_type<tc>, window_params = [{transform_indices = @transform_0, window_bounds = array<i64: 8, 3>}, {transform_indices = @transform_1, window_bounds = array<i64: 8, 1>}, {transform_indices = @transform_2, window_bounds = array<i64: 1, 1, 3>}, {transform_indices = @transform_3, window_bounds = array<i64: 1, 1, 3>}, {transform_indices = @transform_4, window_bounds = array<i64: 1, 1, 3>}]} {
    %c0_i32 = arith.constant 0 : i32
    %0 = arith.cmpi eq, %arg1, %c0_i32 : i32
    %1 = arith.extui %0 : i1 to i32
    %c0_i32_0 = arith.constant 0 : i32
    %2 = arith.cmpi ne, %1, %c0_i32_0 : i32
    scf.if %2 {
      %cst_34 = arith.constant 0.000000e+00 : f32
      %76 = vector.broadcast %cst_34 : f32 to vector<1x1x3xf32>
      %c0_35 = arith.constant 0 : index
      %c0_36 = arith.constant 0 : index
      %c0_37 = arith.constant 0 : index
      %77 = vector.load %arg4[%c0_35, %c0_36, %c0_37] : memref<1x1x3xf32, #tpu.memory_space<vmem>>, vector<1x1x3xf32>
      tpu.vector_store %arg4[%c0_35, %c0_36, %c0_37], %76 {strides = array<i32>} : memref<1x1x3xf32, #tpu.memory_space<vmem>>, vector<1x1x3xf32>,
      %cst_38 = arith.constant 0.000000e+00 : f32
      %78 = vector.broadcast %cst_38 : f32 to vector<1x1x3xf32>
      %c0_39 = arith.constant 0 : index
      %c0_40 = arith.constant 0 : index
      %c0_41 = arith.constant 0 : index
      %79 = vector.load %arg5[%c0_39, %c0_40, %c0_41] : memref<1x1x3xf32, #tpu.memory_space<vmem>>, vector<1x1x3xf32>
      tpu.vector_store %arg5[%c0_39, %c0_40, %c0_41], %78 {strides = array<i32>} : memref<1x1x3xf32, #tpu.memory_space<vmem>>, vector<1x1x3xf32>,
      %cst_42 = arith.constant 0.000000e+00 : f32
      %80 = vector.broadcast %cst_42 : f32 to vector<1x1x3xf32>
      %c0_43 = arith.constant 0 : index
      %c0_44 = arith.constant 0 : index
      %c0_45 = arith.constant 0 : index
      %81 = vector.load %arg6[%c0_43, %c0_44, %c0_45] : memref<1x1x3xf32, #tpu.memory_space<vmem>>, vector<1x1x3xf32>
      tpu.vector_store %arg6[%c0_43, %c0_44, %c0_45], %80 {strides = array<i32>} : memref<1x1x3xf32, #tpu.memory_space<vmem>>, vector<1x1x3xf32>,
    } else {
    }
    %c0 = arith.constant 0 : index
    %c0_1 = arith.constant 0 : index
    %3 = vector.load %arg2[%c0, %c0_1] : memref<8x3xf32, #tpu.memory_space<vmem>>, vector<8x3xf32>
    %c0_2 = arith.constant 0 : index
    %c0_3 = arith.constant 0 : index
    %4 = vector.load %arg3[%c0_2, %c0_3] : memref<8x1xi32, #tpu.memory_space<vmem>>, vector<8x1xi32>
    %c1_i32 = arith.constant 1 : i32
    %5 = arith.muli %arg0, %c1_i32 : i32
    %6 = arith.addi %5, %arg1 : i32
    %c8_i32 = arith.constant 8 : i32
    %7 = arith.muli %6, %c8_i32 : i32
    %8 = tpu.iota {dimensions = array<i32: 0>} : vector<8x1xi32>
    %9 = vector.broadcast %7 : i32 to vector<8x1xi32>
    %10 = arith.addi %9, %8 : vector<8x1xi32>
    %c8_i32_4 = arith.constant 8 : i32
    %11 = vector.broadcast %c8_i32_4 : i32 to vector<8x1xi32>
    %12 = arith.cmpi slt, %10, %11 : vector<8x1xi32>
    %13 = tpu.iota {dimensions = array<i32: 1>} : vector<8x3xi32>
    %14 = vector.broadcast %4 : vector<8x1xi32> to vector<8x3xi32>
    %15 = arith.cmpi eq, %13, %14 : vector<8x3xi32>
    %16 = vector.broadcast %12 : vector<8x1xi1> to vector<8x3xi1>
    %17 = arith.andi %15, %16 : vector<8x3xi1>
    %c0_5 = arith.constant 0 : index
    %c0_6 = arith.constant 0 : index
    %c0_7 = arith.constant 0 : index
    %18 = vector.load %arg4[%c0_5, %c0_6, %c0_7] : memref<1x1x3xf32, #tpu.memory_space<vmem>>, vector<1x1x3xf32>
    %cst = arith.constant 1.000000e+00 : f32
    %cst_8 = arith.constant 0.000000e+00 : f32
    %19 = vector.broadcast %cst : f32 to vector<8x3xf32>
    %20 = vector.broadcast %cst_8 : f32 to vector<8x3xf32>
    %21 = arith.select %17, %19, %20 : vector<8x3xi1>, vector<8x3xf32>
    %cst_9 = arith.constant dense<0.000000e+00> : vector<3xf32>
    %22 = vector.multi_reduction <add>, %21, %cst_9 [0] : vector<8x3xf32> to vector<3xf32>
    %23 = vector.shape_cast %22 : vector<3xf32> to vector<1x3xf32>
    %24 = vector.shape_cast %23 : vector<1x3xf32> to vector<1x1x3xf32>
    %25 = arith.addf %18, %24 : vector<1x1x3xf32>
    %c0_10 = arith.constant 0 : index
    %c0_11 = arith.constant 0 : index
    %c0_12 = arith.constant 0 : index
    %26 = vector.load %arg4[%c0_10, %c0_11, %c0_12] : memref<1x1x3xf32, #tpu.memory_space<vmem>>, vector<1x1x3xf32>
    tpu.vector_store %arg4[%c0_10, %c0_11, %c0_12], %25 {strides = array<i32>} : memref<1x1x3xf32, #tpu.memory_space<vmem>>, vector<1x1x3xf32>,
    %cst_13 = arith.constant dense<0xFF800000> : vector<8xf32>
    %27 = vector.multi_reduction <maximumf>, %3, %cst_13 [1] : vector<8x3xf32> to vector<8xf32>
    %28 = vector.shape_cast %27 : vector<8xf32> to vector<8x1xf32>
    %29 = vector.broadcast %28 : vector<8x1xf32> to vector<8x3xf32>
    %30 = arith.subf %3, %29 : vector<8x3xf32>
    %31 = math.exp %30 : vector<8x3xf32>
    %cst_14 = arith.constant dense<0.000000e+00> : vector<8xf32>
    %32 = vector.multi_reduction <add>, %31, %cst_14 [1] : vector<8x3xf32> to vector<8xf32>
    %33 = vector.shape_cast %32 : vector<8xf32> to vector<8x1xf32>
    %34 = math.log %33 : vector<8x1xf32>
    %35 = arith.addf %34, %28 : vector<8x1xf32>
    %cst_15 = arith.constant 0.000000e+00 : f32
    %36 = vector.broadcast %cst_15 : f32 to vector<8x3xf32>
    %37 = arith.select %17, %3, %36 : vector<8x3xi1>, vector<8x3xf32>
    %cst_16 = arith.constant dense<0.000000e+00> : vector<8xf32>
    %38 = vector.multi_reduction <add>, %37, %cst_16 [1] : vector<8x3xf32> to vector<8xf32>
    %39 = vector.shape_cast %38 : vector<8xf32> to vector<8x1xf32>
    %40 = arith.subf %35, %39 : vector<8x1xf32>
    %41 = math.absf %3 : vector<8x3xf32>
    %cst_17 = arith.constant 1.000000e+02 : f32
    %42 = vector.broadcast %cst_17 : f32 to vector<8x3xf32>
    %43 = arith.cmpf ogt, %41, %42 : vector<8x3xf32>
    %44 = vector.broadcast %12 : vector<8x1xi1> to vector<8x3xi1>
    %45 = arith.andi %43, %44 : vector<8x3xi1>
    %cst_18 = arith.constant 1.000000e+00 : f32
    %cst_19 = arith.constant 0.000000e+00 : f32
    %46 = vector.broadcast %cst_18 : f32 to vector<8x3xf32>
    %47 = vector.broadcast %cst_19 : f32 to vector<8x3xf32>
    %48 = arith.select %45, %46, %47 : vector<8x3xi1>, vector<8x3xf32>
    %49 = vector.shape_cast %48 : vector<8x3xf32> to vector<1x8x3xf32>
    %cst_20 = arith.constant dense<0xFF800000> : vector<1xf32>
    %50 = vector.multi_reduction <maximumf>, %49, %cst_20 [1, 2] : vector<1x8x3xf32> to vector<1xf32>
    %51 = vector.shape_cast %50 : vector<1xf32> to vector<1x1x1xf32>
    %52 = vector.extract %51[0, 0, 0] : f32 from vector<1x1x1xf32>
    %cst_21 = arith.constant 0.000000e+00 : f32
    %53 = arith.cmpf ogt, %52, %cst_21 : f32
    %true = arith.constant true
    %54 = arith.xori %53, %true : i1
    %55 = arith.extui %54 : i1 to i32
    %c0_i32_22 = arith.constant 0 : i32
    %56 = arith.cmpi ne, %55, %c0_i32_22 : i32
    scf.if %56 {
      %c0_34 = arith.constant 0 : index
      %c0_35 = arith.constant 0 : index
      %c0_36 = arith.constant 0 : index
      %76 = vector.load %arg5[%c0_34, %c0_35, %c0_36] : memref<1x1x3xf32, #tpu.memory_space<vmem>>, vector<1x1x3xf32>
      %cst_37 = arith.constant 0.000000e+00 : f32
      %77 = vector.shape_cast %40 : vector<8x1xf32> to vector<8x1xf32>
      %78 = vector.broadcast %77 : vector<8x1xf32> to vector<8x3xf32>
      %79 = vector.broadcast %cst_37 : f32 to vector<8x3xf32>
      %80 = arith.select %17, %78, %79 : vector<8x3xi1>, vector<8x3xf32>
      %cst_38 = arith.constant dense<0.000000e+00> : vector<3xf32>
      %81 = vector.multi_reduction <add>, %80, %cst_38 [0] : vector<8x3xf32> to vector<3xf32>
      %82 = vector.shape_cast %81 : vector<3xf32> to vector<1x3xf32>
      %83 = vector.shape_cast %82 : vector<1x3xf32> to vector<1x1x3xf32>
      %84 = arith.addf %76, %83 : vector<1x1x3xf32>
      %c0_39 = arith.constant 0 : index
      %c0_40 = arith.constant 0 : index
      %c0_41 = arith.constant 0 : index
      %85 = vector.load %arg5[%c0_39, %c0_40, %c0_41] : memref<1x1x3xf32, #tpu.memory_space<vmem>>, vector<1x1x3xf32>
      tpu.vector_store %arg5[%c0_39, %c0_40, %c0_41], %84 {strides = array<i32>} : memref<1x1x3xf32, #tpu.memory_space<vmem>>, vector<1x1x3xf32>,
    } else {
    }
    %57 = arith.extui %53 : i1 to i32
    %c0_i32_23 = arith.constant 0 : i32
    %58 = arith.cmpi ne, %57, %c0_i32_23 : i32
    scf.if %58 {
      %cst_34 = arith.constant -1.000000e+02 : f32
      %cst_35 = arith.constant 1.000000e+02 : f32
      %76 = vector.broadcast %cst_34 : f32 to vector<8x3xf32>
      %77 = arith.maximumf %76, %3 : vector<8x3xf32>
      %78 = vector.broadcast %cst_35 : f32 to vector<8x3xf32>
      %79 = arith.minimumf %78, %77 : vector<8x3xf32>
      %cst_36 = arith.constant -1.000000e+02 : f32
      %cst_37 = arith.constant 1.000000e+02 : f32
      %80 = vector.broadcast %cst_36 : f32 to vector<8x1xf32>
      %81 = arith.maximumf %80, %28 : vector<8x1xf32>
      %82 = vector.broadcast %cst_37 : f32 to vector<8x1xf32>
      %83 = arith.minimumf %82, %81 : vector<8x1xf32>
      %84 = vector.broadcast %83 : vector<8x1xf32> to vector<8x3xf32>
      %85 = arith.subf %79, %84 : vector<8x3xf32>
      %86 = math.exp %85 : vector<8x3xf32>
      %cst_38 = arith.constant dense<0.000000e+00> : vector<8xf32>
      %87 = vector.multi_reduction <add>, %86, %cst_38 [1] : vector<8x3xf32> to vector<8xf32>
      %88 = vector.shape_cast %87 : vector<8xf32> to vector<8x1xf32>
      %89 = math.log %88 : vector<8x1xf32>
      %90 = arith.addf %89, %83 : vector<8x1xf32>
      %cst_39 = arith.constant -1.000000e+02 : f32
      %cst_40 = arith.constant 1.000000e+02 : f32
      %91 = vector.broadcast %cst_39 : f32 to vector<8x1xf32>
      %92 = arith.maximumf %91, %39 : vector<8x1xf32>
      %93 = vector.broadcast %cst_40 : f32 to vector<8x1xf32>
      %94 = arith.minimumf %93, %92 : vector<8x1xf32>
      %95 = arith.subf %90, %94 : vector<8x1xf32>
      %c0_41 = arith.constant 0 : index
      %c0_42 = arith.constant 0 : index
      %c0_43 = arith.constant 0 : index
      %96 = vector.load %arg5[%c0_41, %c0_42, %c0_43] : memref<1x1x3xf32, #tpu.memory_space<vmem>>, vector<1x1x3xf32>
      %cst_44 = arith.constant 0.000000e+00 : f32
      %97 = vector.shape_cast %95 : vector<8x1xf32> to vector<8x1xf32>
      %98 = vector.broadcast %97 : vector<8x1xf32> to vector<8x3xf32>
      %99 = vector.broadcast %cst_44 : f32 to vector<8x3xf32>
      %100 = arith.select %17, %98, %99 : vector<8x3xi1>, vector<8x3xf32>
      %cst_45 = arith.constant dense<0.000000e+00> : vector<3xf32>
      %101 = vector.multi_reduction <add>, %100, %cst_45 [0] : vector<8x3xf32> to vector<3xf32>
      %102 = vector.shape_cast %101 : vector<3xf32> to vector<1x3xf32>
      %103 = vector.shape_cast %102 : vector<1x3xf32> to vector<1x1x3xf32>
      %104 = arith.addf %96, %103 : vector<1x1x3xf32>
      %c0_46 = arith.constant 0 : index
      %c0_47 = arith.constant 0 : index
      %c0_48 = arith.constant 0 : index
      %105 = vector.load %arg5[%c0_46, %c0_47, %c0_48] : memref<1x1x3xf32, #tpu.memory_space<vmem>>, vector<1x1x3xf32>
      tpu.vector_store %arg5[%c0_46, %c0_47, %c0_48], %104 {strides = array<i32>} : memref<1x1x3xf32, #tpu.memory_space<vmem>>, vector<1x1x3xf32>,
    } else {
    }
    %cst_24 = arith.constant 0.000000e+00 : f32
    %59 = vector.broadcast %cst_24 : f32 to vector<8x1xf32>
    %60 = arith.subf %59, %40 : vector<8x1xf32>
    %61 = math.exp %60 : vector<8x1xf32>
    %cst_25 = arith.constant 1.000000e+00 : f32
    %62 = vector.broadcast %cst_25 : f32 to vector<8x1xf32>
    %63 = arith.subf %62, %61 : vector<8x1xf32>
    %64 = arith.mulf %63, %63 : vector<8x1xf32>
    %65 = arith.mulf %64, %40 : vector<8x1xf32>
    %c0_26 = arith.constant 0 : index
    %c0_27 = arith.constant 0 : index
    %c0_28 = arith.constant 0 : index
    %66 = vector.load %arg6[%c0_26, %c0_27, %c0_28] : memref<1x1x3xf32, #tpu.memory_space<vmem>>, vector<1x1x3xf32>
    %cst_29 = arith.constant 0.000000e+00 : f32
    %67 = vector.shape_cast %65 : vector<8x1xf32> to vector<8x1xf32>
    %68 = vector.broadcast %67 : vector<8x1xf32> to vector<8x3xf32>
    %69 = vector.broadcast %cst_29 : f32 to vector<8x3xf32>
    %70 = arith.select %17, %68, %69 : vector<8x3xi1>, vector<8x3xf32>
    %cst_30 = arith.constant dense<0.000000e+00> : vector<3xf32>
    %71 = vector.multi_reduction <add>, %70, %cst_30 [0] : vector<8x3xf32> to vector<3xf32>
    %72 = vector.shape_cast %71 : vector<3xf32> to vector<1x3xf32>
    %73 = vector.shape_cast %72 : vector<1x3xf32> to vector<1x1x3xf32>
    %74 = arith.addf %66, %73 : vector<1x1x3xf32>
    %c0_31 = arith.constant 0 : index
    %c0_32 = arith.constant 0 : index
    %c0_33 = arith.constant 0 : index
    %75 = vector.load %arg6[%c0_31, %c0_32, %c0_33] : memref<1x1x3xf32, #tpu.memory_space<vmem>>, vector<1x1x3xf32>
    tpu.vector_store %arg6[%c0_31, %c0_32, %c0_33], %74 {strides = array<i32>} : memref<1x1x3xf32, #tpu.memory_space<vmem>>, vector<1x1x3xf32>,
    return
  }
  func.func @transform_0(%arg0: i32, %arg1: i32) -> (i32, i32) {
    %c1_i32 = arith.constant 1 : i32
    %0 = arith.muli %arg0, %c1_i32 : i32
    %1 = arith.addi %0, %arg1 : i32
    %c0_i32 = arith.constant 0 : i32
    %2 = arith.minsi %1, %c0_i32 : i32
    %c0_i32_0 = arith.constant 0 : i32
    %c0_i32_1 = arith.constant 0 : i32
    return %2, %c0_i32_0 : i32, i32
  }
  func.func @transform_1(%arg0: i32, %arg1: i32) -> (i32, i32) {
    %c1_i32 = arith.constant 1 : i32
    %0 = arith.muli %arg0, %c1_i32 : i32
    %1 = arith.addi %0, %arg1 : i32
    %c0_i32 = arith.constant 0 : i32
    %2 = arith.minsi %1, %c0_i32 : i32
    %c0_i32_0 = arith.constant 0 : i32
    %c0_i32_1 = arith.constant 0 : i32
    return %2, %c0_i32_0 : i32, i32
  }
  func.func @transform_2(%arg0: i32, %arg1: i32) -> (i32, i32, i32) {
    %c0_i32 = arith.constant 0 : i32
    %c0_i32_0 = arith.constant 0 : i32
    %c0_i32_1 = arith.constant 0 : i32
    return %arg0, %c0_i32, %c0_i32_0 : i32, i32, i32
  }
  func.func @transform_3(%arg0: i32, %arg1: i32) -> (i32, i32, i32) {
    %c0_i32 = arith.constant 0 : i32
    %c0_i32_0 = arith.constant 0 : i32
    %c0_i32_1 = arith.constant 0 : i32
    return %arg0, %c0_i32, %c0_i32_0 : i32, i32, i32
  }
  func.func @transform_4(%arg0: i32, %arg1: i32) -> (i32, i32, i32) {
    %c0_i32 = arith.constant 0 : i32
    %c0_i32_0 = arith.constant 0 : i32
    %c0_i32_1 = arith.constant 0 : i32
    return %arg0, %c0_i32, %c0_i32_0 : i32, i32, i32
  }
}

</mosaic_0001>

<bundles_post_ra>
// kernel: tpu_custom_call.1
= control target key start
LH: loop header
LB: loop body
LE: loop exit
PB: predicated region body
PF: predicated region fallthrough
CT: control target
= control target key end

     0   :  { %10 = vsyncpa [#allocation3], 0  ;;  %vm98_vm0 = vcmask 23552   ;;  %vm74_vm1 = vcmask 16384   ;;  %v340_v2 = vmov 0   ;;  %v341_v4 = vmov 0.0   ;;  %s434_s0 = inlined_call_operand.vmem [shape: f32[8,3], index: 0, kind: input, shape index: {}]   ;;  %s435_s1 = inlined_call_operand.vmem [shape: s32[8,1], index: 1, kind: input, shape index: {}]   ;;  %s436_s2 = inlined_call_operand.hbm [shape: f32[1,1,3], index: 2, kind: output, shape index: {0}]   ;;  %s437_s3 = inlined_call_operand.hbm [shape: f32[1,1,3], index: 3, kind: output, shape index: {1}]   ;;  %s438_s4 = inlined_call_operand.hbm [shape: f32[1,1,3], index: 4, kind: output, shape index: {2}]  }
   0x1   :  { %v373_v0 = vld [vmem:[%s434_s0] sm:$0xff]  ;;  %265 = vset.pattern.permute.xlu0 %v340_v2  ;;  %75 = vst.msk [vmem:[#allocation2] sm:$0x1] %vm74_vm1, %v341_v4  ;;  %76 = vst.msk [vmem:[#allocation4] sm:$0x1] %vm74_vm1, %v341_v4 }
   0x2   :  { %v109_v1 = vsel %vm98_vm0, %v373_v0, -inf  ;;  %v126_v3 = vand.u32 2147483647, %v373_v0  ;;  %77 = vst.msk [vmem:[#allocation6] sm:$0x1] %vm74_vm1, %v341_v4 }
   0x3   :  { %11 = vsyncpa [#allocation5], 0  ;;  %110 = vmax.xlane.f32.xlu0 %v109_v1  ;;  %v79_v7 = vld [vmem:[%s435_s1] sm:$0xff]  ;;  %v87_v10 = vlaneseq }
   0x4   :  { %vm127_vm2 = vcmp.gt.f32.partialorder %v126_v3, 100.0 }
   0x5   :  { %v129_v5 = vsel %vm127_vm2, 1.0, %v341_v4  ;;  %v88_v13 = vand.u32 127, %v87_v10 }
   0x6   :  { %v130_v6 = vsel %vm98_vm0, %v129_v5, -inf }
   0x7   :  { %131 = vmax.xlane.f32.xlu1 %v130_v6 }
   0x8   :  { %v96_v32 = vld [vmem:[#allocation2] sm:$0x1] }
  0x19   :  { %90 = vperm.xlu0 %265, %v79_v7  }
  0x8c   :  { %v111_v8 = vpop.xlane.xlu0 %110 }
  0x8d   :  { %v112_v9 = vsub.f32 %v373_v0, %v111_v8 }
  0x8f   :  { %v113_v11 = vmul.f32 1.442695, %v112_v9 }
  0x90   :  { %v132_v12 = vpop.xlane.xlu1 %131 }
  0x91   :  { %266 = vpow2.f32 %v113_v11  ;;  %v133_v14 = vrot.slane %v132_v12, 4 }
  0x93   :  { %v134_v15 = vmax.f32 %v132_v12, %v133_v14 }
  0x94   :  { %v91_v16 = vpop.permute.xlu0 %90 }
  0x95   :  { %vm386_vm3 = vcmp.eq.s32.totalorder %v88_v13, %v91_v16  ;;  %v135_v18 = vrot.slane %v134_v15, 2 }
  0x96   :  { %v97_v19 = vsel %vm386_vm3, 1.0, %v341_v4  ;;  %v121_v29 = vsel %vm386_vm3, %v373_v0, 0.0 }
  0x97   :  { %v99_v20 = vsel %vm98_vm0, %v97_v19, 0.0  ;;  %v136_v21 = vmax.f32 %v134_v15, %v135_v18  ;;  %v122_v33 = vsel %vm98_vm0, %v121_v29, 0.0 }
  0x98   :  { %v100_v22 = vrot.slane %v99_v20, 4 }
  0x99   :  { %v137_v23 = vrot.slane %v136_v21, 1 }
  0x9a   :  { %v101_v24 = vadd.f32 %v100_v22, %v99_v20 }
  0x9b   :  { %v138_v25 = vmax.f32 %v136_v21, %v137_v23 }
  0x9c   :  { %v102_v26 = vrot.slane %v101_v24, 2 }
  0x9d   :  { %258 = vpush %v138_v25 }
  0x9e   :  { %v267_v27 = vpop.eup %266  ;;  %v103_v28 = vadd.f32 %v102_v26, %v101_v24 }
  0x9f   :  { %v115_v30 = vsel %vm98_vm0, %v267_v27, 0.0 }
  0xa0   :  { %116 = vadd.xlane.f32.xlu1 %v115_v30  ;;  %v104_v31 = vrot.slane %v103_v28, 1 }
  0xa2   :  { %v105_v34 = vadd.f32 %v104_v31, %v103_v28 }
  0xa4   :  { %v106_v35 = vadd.f32 %v105_v34, %v96_v32  ;;  %123 = vadd.xlane.f32.xlu1 %v122_v33 }
  0xa6   :  { %108 = vst.msk [vmem:[#allocation2] sm:$0x1] %vm74_vm1, %v106_v35 }
  0xce   :  { %s399_s1 = spop %258 }
  0xcf   :  { %p140_p0 = scmp.gt.f32.partialorder %s399_s1, 0.0 }
  0xd0   :  { %v255_v42 = vclamps-f32 (%p140_p0), %v373_v0, 100.0  ;;  %v256_v43 = vclamps-f32 (%p140_p0), %v111_v8, 100.0  ;;  %v160_v61 = vld [vmem:[#allocation4] sm:$0x1] (%p140_p0) }
  0xd2   :  { %v148_v44 = vsub.f32 (%p140_p0), %v255_v42, %v256_v43 }
  0xd4   :  { %v149_v45 = vmul.f32 (%p140_p0), 1.442695, %v148_v44 }
 0x129   :  { %v117_v36 = vpop.xlane.xlu1 %116 }
 0x12a   :  { %268 = vlog2.f32 %v117_v36 }
 0x12b   :  { %270 = vpow2.f32 (%p140_p0), %v149_v45 }
 0x12d   :  { %v124_v39 = vpop.xlane.xlu1 %123 }
 0x12e   :  { %v257_v51 = vclamps-f32 (%p140_p0), %v124_v39, 100.0 }
 0x137   :  { %v269_v37 = vpop.eup %268 }
 0x138   :  { %v119_v38 = vmul.f32 0.6931472, %v269_v37  ;;  %143 = sbr.rel (!%p140_p0) target bundleno = 489 (0x1e9), region = 17  ;;  %v271_v46 = vpop.eup (%p140_p0), %270 }
 0x139   :  { %v151_v47 = vsel (%p140_p0), %vm98_vm0, %v271_v46, 0.0 }
 0x13a   :  { %v120_v40 = vadd.f32 %v119_v38, %v111_v8  ;;  %152 = vadd.xlane.f32.xlu0 (%p140_p0), %v151_v47 }
 0x13c   :  { %v402_v41 = vsub.f32 %v120_v40, %v124_v39 }
 0x1c3   :  { %v153_v48 = vpop.xlane.xlu0 %152 }
 0x1c4   :  { %272 = vlog2.f32 %v153_v48 }
 0x1d1   :  { %v273_v49 = vpop.eup %272 }
 0x1d2   :  { %v155_v50 = vmul.f32 0.6931472, %v273_v49 }
 0x1d4   :  { %v156_v52 = vadd.f32 %v256_v43, %v155_v50 }
 0x1d6   :  { %v159_v53 = vsub.f32 %v156_v52, %v257_v51 }
 0x1d8   :  { %v161_v54 = vsel %vm386_vm3, %v159_v53, 0.0 }
 0x1d9   :  { %v162_v55 = vsel %vm98_vm0, %v161_v54, 0.0 }
 0x1da   :  { %v163_v56 = vrot.slane %v162_v55, 4 }
 0x1dc   :  { %v164_v57 = vadd.f32 %v163_v56, %v162_v55 }
 0x1de   :  { %v165_v58 = vrot.slane %v164_v57, 2 }
 0x1e0   :  { %v166_v59 = vadd.f32 %v165_v58, %v164_v57 }
 0x1e2   :  { %v167_v60 = vrot.slane %v166_v59, 1 }
 0x1e4   :  { %v168_v62 = vadd.f32 %v167_v60, %v166_v59 }
 0x1e6   :  { %v169_v63 = vadd.f32 %v168_v62, %v160_v61 }
 0x1e8   :  { %170 = vst.msk [vmem:[#allocation4] sm:$0x1] %vm74_vm1, %v169_v63 }
 0x1e9 PF:  { %173 = sbr.rel (%p140_p0) target bundleno = 511 (0x1ff), region = 21 }
 0x1ee   :  { %v175_v0 = vsel %vm386_vm3, %v402_v41, 0.0 }
 0x1ef   :  { %v176_v1 = vsel %vm98_vm0, %v175_v0, 0.0  ;;  %v174_v7 = vld [vmem:[#allocation4] sm:$0x1] }
 0x1f0   :  { %v177_v2 = vrot.slane %v176_v1, 4 }
 0x1f2   :  { %v178_v3 = vadd.f32 %v177_v2, %v176_v1 }
 0x1f4   :  { %v179_v4 = vrot.slane %v178_v3, 2 }
 0x1f6   :  { %v180_v5 = vadd.f32 %v179_v4, %v178_v3 }
 0x1f8   :  { %v181_v6 = vrot.slane %v180_v5, 1 }
 0x1fa   :  { %v182_v8 = vadd.f32 %v181_v6, %v180_v5 }
 0x1fc   :  { %v183_v9 = vadd.f32 %v182_v8, %v174_v7 }
 0x1fe   :  { %184 = vst.msk [vmem:[#allocation4] sm:$0x1] %vm74_vm1, %v183_v9 }
 0x1ff PF:  { %v185_v10 = vsub.f32 0.0, %v402_v41  ;;  %s342_s18 = smov [#allocation4]   ;;  %s343_s20 = smov [#allocation2]  }
 0x200   :  { %s218_s19 = sshll.u32 %s342_s18, 4  ;;  %s208_s21 = sshll.u32 %s343_s20, 4  ;;  %s219_s19 = int_to_ptr.vmem [resolvable:$true] %s218_s19  ;;  %s209_s21 = int_to_ptr.vmem [resolvable:$true] %s208_s21 }
 0x201   :  { %v186_v11 = vmul.f32 1.442695, %v185_v10  ;;  %s276_s22 = scalar_lea.vmem %s219_s19, 16  ;;  %s280_s23 = scalar_lea.vmem %s219_s19, 32 }
 0x202   :  { %p277_p1 = scmp.ne.s32.totalorder %s219_s19, %s276_s22  ;;  %p281_p2 = scmp.lt.s32.totalorder %s219_s19, %s219_s19 }
 0x203   :  { %p282_p3 = scmp.lt.s32.totalorder %s280_s23, %s276_s22 }
 0x205   :  { %p283_p4 = por %p282_p3, %p281_p2 }
 0x207   :  { %p284_p5 = pnand %p283_p4, %p277_p1 }
 0x209   :  { %287 = shalt.err (!%p284_p5)
}
 0x20a   :  { %221 = dma.vmem_to_hbm [thread:$0]  %s219_s19, 16, %s437_s3, [#allocation5]   ;;  %274 = vpow2.f32 %v186_v11 }
 0x20b   :  { %s296_s26 = scalar_lea.vmem %s209_s21, 16  ;;  %s300_s27 = scalar_lea.vmem %s209_s21, 32 }
 0x20c   :  { %p297_p6 = scmp.ne.s32.totalorder %s209_s21, %s296_s26  ;;  %p301_p7 = scmp.lt.s32.totalorder %s209_s21, %s209_s21 }
 0x20d   :  { %p302_p8 = scmp.lt.s32.totalorder %s300_s27, %s296_s26 }
 0x20f   :  { %p303_p9 = por %p302_p8, %p301_p7 }
 0x211   :  { %p304_p10 = pnand %p303_p9, %p297_p6 }
 0x213   :  { %307 = shalt.err (!%p304_p10)
}
 0x214   :  { %211 = dma.vmem_to_hbm [thread:$0]  %s209_s21, 16, %s436_s2, [#allocation3]   ;;  %v191_v24 = vld [vmem:[#allocation6] sm:$0x1] }
 0x215   :  { %s344_s3 = smov [#allocation6]  }
 0x216   :  { %s228_s30 = sshll.u32 %s344_s3, 4  ;;  %s229_s30 = int_to_ptr.vmem [resolvable:$true] %s228_s30 }
 0x217   :  { %v275_v12 = vpop.eup %274  ;;  %s316_s2 = scalar_lea.vmem %s229_s30, 16  ;;  %s320_s5 = scalar_lea.vmem %s229_s30, 32 }
 0x218   :  { %v188_v13 = vsub.f32 1.0, %v275_v12  ;;  %p317_p11 = scmp.ne.s32.totalorder %s229_s30, %s316_s2  ;;  %p321_p12 = scmp.lt.s32.totalorder %s229_s30, %s229_s30 }
 0x219   :  { %p322_p13 = scmp.lt.s32.totalorder %s320_s5, %s316_s2 }
 0x21a   :  { %v189_v14 = vmul.f32 %v188_v13, %v188_v13 }
 0x21b   :  { %p323_p0 = por %p322_p13, %p321_p12 }
 0x21c   :  { %v190_v15 = vmul.f32 %v189_v14, %v402_v41 }
 0x21d   :  { %p324_p1 = pnand %p323_p0, %p317_p11 }
 0x21e   :  { %v192_v16 = vsel %vm386_vm3, %v190_v15, 0.0 }
 0x21f   :  { %v193_v18 = vsel %vm98_vm0, %v192_v16, 0.0 }
 0x220   :  { %v194_v19 = vrot.slane %v193_v18, 4 }
 0x222   :  { %v195_v20 = vadd.f32 %v194_v19, %v193_v18 }
 0x224   :  { %v196_v21 = vrot.slane %v195_v20, 2 }
 0x226   :  { %v197_v22 = vadd.f32 %v196_v21, %v195_v20 }
 0x228   :  { %v198_v23 = vrot.slane %v197_v22, 1 }
 0x22a   :  { %v199_v25 = vadd.f32 %v198_v23, %v197_v22 }
 0x22c   :  { %v200_v26 = vadd.f32 %v199_v25, %v191_v24 }
 0x22e   :  { %201 = vst.msk [vmem:[#allocation6] sm:$0x1] %vm74_vm1, %v200_v26 }
 0x22f   :  { %327 = shalt.err (!%p324_p1)
}
 0x230   :  { %231 = dma.vmem_to_hbm [thread:$0]  %s229_s30, 16, %s438_s4, [#allocation5]  }
 0x231   :  { %336 = dma.done.wait [#allocation3], 16  }
 0x232   :  { %337 = vsyncadd [#allocation3], 4294967280 }
 0x233   :  { %338 = dma.done.wait [#allocation5], 32  }
 0x234   :  { %339 = vsyncadd [#allocation5], 4294967264 }
 0x235   :  { %241 = vsyncpa [#allocation3], 1 }
 0x236   :  { %242 = vsyncpa [#allocation5], 1 }

</bundles_post_ra>
